<compile_context>
chip_gen: v6e
topology: v6e:2x2x1
jax: 0.10.0
libtpu: 0.0.40
codegen_flags: <defaults>
</compile_context>

<pallas_src>
import numpy as np
import jax
import jax.numpy as jnp
from jax.experimental import pallas as pl
from jax.experimental.pallas import tpu as pltpu


# ----------------------------------------------------------------------------- state space / impulse
def _expm(M):
    """Scaling-and-squaring Taylor expm in float64 (replaces scipy cont2discrete's expm)."""
    M = np.asarray(M, dtype=np.float64)
    norm = np.linalg.norm(M, 1)
    s = int(np.ceil(np.log2(norm / 0.5))) if norm > 0.5 else 0
    A = M / (2.0 ** s)
    n = M.shape[0]
    E = np.eye(n)
    term = np.eye(n)
    for k in range(1, 40):
        term = term @ A / k
        E = E + term
    for _ in range(s):
        E = E @ E
    return E


def state_space_matrices(memory_size, theta):
    """Discretized (ZOH, dt=1) LMU state-space matrices A, B (float32)."""
    q = np.arange(memory_size, dtype=np.float64)
    R = ((2.0 * q + 1.0) / theta).reshape(-1, 1)
    i = q.reshape(-1, 1)
    j = q.reshape(1, -1)
    A = R * np.where(i < j, -1.0, (-1.0) ** (i - j + 1))
    B = R * ((-1.0) ** q).reshape(-1, 1)
    n = memory_size
    M = np.zeros((n + 1, n + 1), dtype=np.float64)
    M[:n, :n] = A
    M[:n, n:] = B
    E = _expm(M)  # dt = 1.0
    return E[:n, :n].astype(np.float32), E[:n, n:].astype(np.float32)


def impulse_response(Ad, Bd, seq_len):
    """H = [B, AB, A^2 B, ...] of shape [memory_size, seq_len] (float32, like the PyTorch buffer)."""
    K = Ad.shape[0]
    H = np.zeros((K, seq_len), dtype=np.float32)
    A_i = np.eye(K, dtype=np.float32)
    for t in range(seq_len):
        H[:, t:t + 1] = A_i @ Bd
        A_i = Ad @ A_i
    return H


# ----------------------------------------------------------------------------- parameters
def init_params(dim, key):
    D = Hn = K = C = dim
    ks = jax.random.split(key, 5)
    return {
        "W_u": jax.random.normal(ks[0], (1, D), jnp.float32) * 0.3,
        "b_u": jnp.full((1,), 0.05, jnp.float32),
        "W_h": jax.random.normal(ks[1], (Hn, K + D), jnp.float32) * (1.0 / np.sqrt(K + D)),
        "b_h": jax.random.normal(ks[2], (Hn,), jnp.float32) * 0.02,
        "W_c": jax.random.normal(ks[3], (C, Hn), jnp.float32) * (1.0 / np.sqrt(Hn)),  # Conv1d k=1 weight [:,:,0]
        "b_c": jax.random.normal(ks[4], (C,), jnp.float32) * 0.02,
        "gamma": jnp.ones((C,), jnp.float32),   # BatchNorm1d defaults
        "beta": jnp.zeros((C,), jnp.float32),
    }


def build_kernel_operands(params, dim, T, H_imp):
    """Pre-arrange weights for the fused kernel. Everything keeps its original small shape;
    the only T-structured object is the causal impulse tensor G3 (O(T^2 * dim), f32)."""
    D = Hn = K = C = dim
    W_u = np.asarray(params["W_u"], np.float32)      # [1, D]
    W_h = np.asarray(params["W_h"], np.float32)      # [Hn, K + D]
    W_c = np.asarray(params["W_c"], np.float32)      # [C, Hn]
    Wh_m, Wh_x = W_h[:, :K], W_h[:, K:]

    # torch.fft.rfft/irfft(n=2T)[:T] is exactly a causal linear convolution of u with H;
    # fold W_h's memory half into the impulse response:  G3[s, h, t] = (Wh_m @ H)[h, t-s]·[t>=s].
    WhmH = Wh_m @ H_imp                              # [Hn, T]
    G3 = np.zeros((T, Hn, T), np.float32)
    for s in range(T):
        G3[s, :, s:] = WhmH[:, :T - s]

    bf16 = jnp.bfloat16
    return (
        jnp.asarray(W_u.reshape(D, 1), jnp.float32),                           # wu_col [D, 1]
        jnp.asarray(np.asarray(params["b_u"]).reshape(1, 1), jnp.float32),     # bu     [1, 1] (SMEM)
        jnp.asarray(G3, jnp.float32),                                          # g3     [T, Hn, T] f32
        jnp.asarray(Wh_x, bf16),                                               # whx    [Hn, D]
        jnp.asarray(np.asarray(params["b_h"]).reshape(Hn, 1), jnp.float32),    # bh     [Hn, 1]
        jnp.asarray(W_c, bf16),                                                # wc     [C, Hn]
        jnp.asarray(np.asarray(params["b_c"]).reshape(C, 1), jnp.float32),     # bc     [C, 1]
        jnp.asarray(np.asarray(params["gamma"]).reshape(C, 1), jnp.float32),   # gamma  [C, 1]
        jnp.asarray(np.asarray(params["beta"]).reshape(C, 1), jnp.float32),    # beta   [C, 1]
    )


# ----------------------------------------------------------------------------- fused Pallas kernel
def lmu_fused_kernel(x_ref, wu_ref, bu_ref, g3_ref, whx_ref, bh_ref,
                     wc_ref, bc_ref, gamma_ref, beta_ref, o_ref):
    """Whole LMU block in one kernel, NCW in / NCW out.

    x_ref : [B, D, T] f32 (module-native layout, no wrapper transpose)
    o_ref : [B, C, T] f32
    The batch loop (B small) and the causal-conv source loop (T small) are Python-unrolled,
    so every op is a 2-D matmul / broadcast / reduction — no in-kernel reshape or transpose.
    """
    B, D, T = x_ref.shape
    Hn = whx_ref.shape[0]
    C = wc_ref.shape[0]
    bu = bu_ref[0, 0]                                                  # SMEM scalar

    ys = []
    sum_c = jnp.zeros((C, 1), jnp.float32)
    for b in range(B):
        xb = x_ref[b]                                                  # [D, T] f32
        # u[b, t] = relu(sum_d W_u[d] * x[b, d, t] + b_u)  — VPU mul + sublane reduce (no MXU).
        u_b = jnp.maximum(
            jnp.sum(xb * wu_ref[...], axis=0, keepdims=True) + bu, 0.0)   # [1, T] f32

        # hm[b, h, t] = sum_{s<=t} u[b, s] * (Wh_m @ H)[h, t-s]  — causal conv via the
        # precomputed G3[s] tiles; tiny broadcast FMAs on the VPU (T unrolled).
        hm_b = jnp.zeros((Hn, T), jnp.float32)
        for s in range(T):
            hm_b = hm_b + u_b[:, s:s + 1] * g3_ref[s]                  # [1,1] * [Hn, T]

        # hx = Wh_x @ x_b ; h = relu(hm + hx + b_h)   (bf16 MXU, f32 accumulation)
        hx_b = jnp.dot(whx_ref[...], xb.astype(jnp.bfloat16),
                       preferred_element_type=jnp.float32)             # [Hn, T]
        h_b = jnp.maximum(hm_b + hx_b + bh_ref[...], 0.0)

        # 1x1 Conv1d
        y_b = jnp.dot(wc_ref[...], h_b.astype(jnp.bfloat16),
                      preferred_element_type=jnp.float32) + bc_ref[...]  # [C, T]
        ys.append(y_b)
        sum_c = sum_c + jnp.sum(y_b, axis=1, keepdims=True)

    # BatchNorm1d, training mode: biased variance over (batch, time). Pure VPU/XLU.
    inv_n = jnp.float32(1.0 / (B * T))
    mean = sum_c * inv_n                                               # [C, 1]
    var = jnp.zeros_like(mean)
    for b in range(B):
        cen = ys[b] - mean
        var = var + jnp.sum(cen * cen, axis=1, keepdims=True)
    var = var * inv_n
    scale = gamma_ref[...] * jax.lax.rsqrt(var + 1e-5)                 # [C, 1]
    shift = beta_ref[...] - mean * scale
    for b in range(B):
        o_ref[b] = ys[b] * scale + shift                               # [C, T] store per batch


def lmu_forward(x, operands):
    """x: [B, dim, T] (NCW, as the PyTorch module receives it). Returns [B, dim, T]."""
    B, D, T = x.shape
    (wu_col, bu, g3, whx, bh_col, wc, bc_col, gamma_col, beta_col) = operands
    vmem = pl.BlockSpec(memory_space=pltpu.MemorySpace.VMEM)
    smem = pl.BlockSpec(memory_space=pltpu.MemorySpace.SMEM)
    return pl.pallas_call(
        lmu_fused_kernel,
        out_shape=jax.ShapeDtypeStruct((B, D, T), jnp.float32),
        in_specs=[vmem, vmem, smem, vmem, vmem, vmem, vmem, vmem, vmem, vmem],
        out_specs=vmem,
    )(x, wu_col, bu, g3, whx, bh_col, wc, bc_col, gamma_col, beta_col)


# ----------------------------------------------------------------------------- pure-JAX reference (FFT path)
def lmu_reference(x, p, H_imp):
    B, C, T = x.shape
    xt = jnp.transpose(x, (0, 2, 1))                                # [B, T, D]
    u = jax.nn.relu(xt @ p["W_u"].T + p["b_u"])                     # [B, T, 1]
    fft_in = jnp.transpose(u, (0, 2, 1))                            # [B, 1, T]
    fft_u = jnp.fft.rfft(fft_in, n=2 * T, axis=-1)
    fft_H = jnp.fft.rfft(H_imp, n=2 * T, axis=-1)                   # [K, T+1]
    m = jnp.fft.irfft(fft_u * fft_H[None], n=2 * T, axis=-1)[:, :, :T]
    m = jnp.transpose(m, (0, 2, 1))                                 # [B, T, K]
    inp = jnp.concatenate([m, xt], axis=-1)
    h = jax.nn.relu(inp @ p["W_h"].T + p["b_h"])                    # [B, T, H]
    ht = jnp.transpose(h, (0, 2, 1))                                # [B, H, T]
    y = jnp.einsum("oi,bit->bot", p["W_c"], ht) + p["b_c"][None, :, None]
    mean = jnp.mean(y, axis=(0, 2), keepdims=True)
    var = jnp.mean((y - mean) ** 2, axis=(0, 2), keepdims=True)
    yn = (y - mean) / jnp.sqrt(var + 1e-5)
    return yn * p["gamma"][None, :, None] + p["beta"][None, :, None]


# ----------------------------------------------------------------------------- main
if __name__ == "__main__":
    B, dim, T = 2, 32, 8                       # LMU(dim=32, T=8); x: [B, dim, T]
    key = jax.random.PRNGKey(0)
    kx, kp = jax.random.split(key)
    x = jax.random.normal(kx, (B, dim, T), jnp.float32)

    params = init_params(dim, kp)
    Ad, Bd = state_space_matrices(dim, float(T))     # theta = T
    H_imp = impulse_response(Ad, Bd, T)              # [memory_size, T]
    operands = build_kernel_operands(params, dim, T, H_imp)

    out = jax.block_until_ready(lmu_forward(x, operands))
    assert out.shape == (B, dim, T) and out.dtype == jnp.float32

    ref = jax.block_until_ready(lmu_reference(x, params, jnp.asarray(H_imp)))
    # bf16 MXU operands (Wh_x, W_c paths) with f32 accumulation -> loose tolerance.
    np.testing.assert_allclose(np.asarray(out), np.asarray(ref), rtol=3e-2, atol=3e-2)

    print("KERNEL_OK")
</pallas_src>

<mosaic_0001>
module attributes {stable_mosaic.version = 11 : i64} {
  func.func @lmu_fused_kernel(%arg0: memref<2x32x8xf32, #tpu.memory_space<vmem>>, %arg1: memref<32x1xf32, #tpu.memory_space<vmem>>, %arg2: memref<1x1xf32, #tpu.memory_space<smem>>, %arg3: memref<8x32x8xf32, #tpu.memory_space<vmem>>, %arg4: memref<32x32xbf16, #tpu.memory_space<vmem>>, %arg5: memref<32x1xf32, #tpu.memory_space<vmem>>, %arg6: memref<32x32xbf16, #tpu.memory_space<vmem>>, %arg7: memref<32x1xf32, #tpu.memory_space<vmem>>, %arg8: memref<32x1xf32, #tpu.memory_space<vmem>>, %arg9: memref<32x1xf32, #tpu.memory_space<vmem>>, %arg10: memref<2x32x8xf32, #tpu.memory_space<vmem>>) attributes {dimension_semantics = [], scalar_prefetch = 0 : i64, scratch_operands = 0 : i64, tpu.core_type = #tpu.core_type<tc>} {
    %c0 = arith.constant 0 : index
    %c0_0 = arith.constant 0 : index
    %0 = memref.load %arg2[%c0, %c0_0] : memref<1x1xf32, #tpu.memory_space<smem>>
    %cst = arith.constant 0.000000e+00 : f32
    %1 = vector.broadcast %cst : f32 to vector<32x1xf32>
    %c0_1 = arith.constant 0 : index
    %c0_2 = arith.constant 0 : index
    %c0_3 = arith.constant 0 : index
    %2 = vector.load %arg0[%c0_1, %c0_2, %c0_3] : memref<2x32x8xf32, #tpu.memory_space<vmem>>, vector<1x32x8xf32>
    %3 = vector.shape_cast %2 : vector<1x32x8xf32> to vector<32x8xf32>
    %c0_4 = arith.constant 0 : index
    %c0_5 = arith.constant 0 : index
    %4 = vector.load %arg1[%c0_4, %c0_5] : memref<32x1xf32, #tpu.memory_space<vmem>>, vector<32x1xf32>
    %5 = vector.broadcast %4 : vector<32x1xf32> to vector<32x8xf32>
    %6 = arith.mulf %3, %5 : vector<32x8xf32>
    %cst_6 = arith.constant dense<0.000000e+00> : vector<8xf32>
    %7 = vector.multi_reduction <add>, %6, %cst_6 [0] : vector<32x8xf32> to vector<8xf32>
    %8 = vector.shape_cast %7 : vector<8xf32> to vector<1x8xf32>
    %9 = vector.broadcast %0 : f32 to vector<1x8xf32>
    %10 = arith.addf %8, %9 : vector<1x8xf32>
    %cst_7 = arith.constant 0.000000e+00 : f32
    %11 = vector.broadcast %cst_7 : f32 to vector<1x8xf32>
    %12 = arith.maximumf %10, %11 : vector<1x8xf32>
    %cst_8 = arith.constant 0.000000e+00 : f32
    %13 = vector.broadcast %cst_8 : f32 to vector<32x8xf32>
    %14 = vector.extract_strided_slice %12 {offsets = [0, 0], sizes = [1, 1], strides = [1, 1]} : vector<1x8xf32> to vector<1x1xf32>
    %c0_9 = arith.constant 0 : index
    %c0_10 = arith.constant 0 : index
    %c0_11 = arith.constant 0 : index
    %15 = vector.load %arg3[%c0_9, %c0_10, %c0_11] : memref<8x32x8xf32, #tpu.memory_space<vmem>>, vector<1x32x8xf32>
    %16 = vector.shape_cast %15 : vector<1x32x8xf32> to vector<32x8xf32>
    %17 = vector.broadcast %14 : vector<1x1xf32> to vector<32x8xf32>
    %18 = arith.mulf %17, %16 : vector<32x8xf32>
    %19 = arith.addf %13, %18 : vector<32x8xf32>
    %20 = vector.extract_strided_slice %12 {offsets = [0, 1], sizes = [1, 1], strides = [1, 1]} : vector<1x8xf32> to vector<1x1xf32>
    %c1 = arith.constant 1 : index
    %c0_12 = arith.constant 0 : index
    %c0_13 = arith.constant 0 : index
    %21 = vector.load %arg3[%c1, %c0_12, %c0_13] : memref<8x32x8xf32, #tpu.memory_space<vmem>>, vector<1x32x8xf32>
    %22 = vector.shape_cast %21 : vector<1x32x8xf32> to vector<32x8xf32>
    %23 = vector.broadcast %20 : vector<1x1xf32> to vector<32x8xf32>
    %24 = arith.mulf %23, %22 : vector<32x8xf32>
    %25 = arith.addf %19, %24 : vector<32x8xf32>
    %26 = vector.extract_strided_slice %12 {offsets = [0, 2], sizes = [1, 1], strides = [1, 1]} : vector<1x8xf32> to vector<1x1xf32>
    %c2 = arith.constant 2 : index
    %c0_14 = arith.constant 0 : index
    %c0_15 = arith.constant 0 : index
    %27 = vector.load %arg3[%c2, %c0_14, %c0_15] : memref<8x32x8xf32, #tpu.memory_space<vmem>>, vector<1x32x8xf32>
    %28 = vector.shape_cast %27 : vector<1x32x8xf32> to vector<32x8xf32>
    %29 = vector.broadcast %26 : vector<1x1xf32> to vector<32x8xf32>
    %30 = arith.mulf %29, %28 : vector<32x8xf32>
    %31 = arith.addf %25, %30 : vector<32x8xf32>
    %32 = vector.extract_strided_slice %12 {offsets = [0, 3], sizes = [1, 1], strides = [1, 1]} : vector<1x8xf32> to vector<1x1xf32>
    %c3 = arith.constant 3 : index
    %c0_16 = arith.constant 0 : index
    %c0_17 = arith.constant 0 : index
    %33 = vector.load %arg3[%c3, %c0_16, %c0_17] : memref<8x32x8xf32, #tpu.memory_space<vmem>>, vector<1x32x8xf32>
    %34 = vector.shape_cast %33 : vector<1x32x8xf32> to vector<32x8xf32>
    %35 = vector.broadcast %32 : vector<1x1xf32> to vector<32x8xf32>
    %36 = arith.mulf %35, %34 : vector<32x8xf32>
    %37 = arith.addf %31, %36 : vector<32x8xf32>
    %38 = vector.extract_strided_slice %12 {offsets = [0, 4], sizes = [1, 1], strides = [1, 1]} : vector<1x8xf32> to vector<1x1xf32>
    %c4 = arith.constant 4 : index
    %c0_18 = arith.constant 0 : index
    %c0_19 = arith.constant 0 : index
    %39 = vector.load %arg3[%c4, %c0_18, %c0_19] : memref<8x32x8xf32, #tpu.memory_space<vmem>>, vector<1x32x8xf32>
    %40 = vector.shape_cast %39 : vector<1x32x8xf32> to vector<32x8xf32>
    %41 = vector.broadcast %38 : vector<1x1xf32> to vector<32x8xf32>
    %42 = arith.mulf %41, %40 : vector<32x8xf32>
    %43 = arith.addf %37, %42 : vector<32x8xf32>
    %44 = vector.extract_strided_slice %12 {offsets = [0, 5], sizes = [1, 1], strides = [1, 1]} : vector<1x8xf32> to vector<1x1xf32>
    %c5 = arith.constant 5 : index
    %c0_20 = arith.constant 0 : index
    %c0_21 = arith.constant 0 : index
    %45 = vector.load %arg3[%c5, %c0_20, %c0_21] : memref<8x32x8xf32, #tpu.memory_space<vmem>>, vector<1x32x8xf32>
    %46 = vector.shape_cast %45 : vector<1x32x8xf32> to vector<32x8xf32>
    %47 = vector.broadcast %44 : vector<1x1xf32> to vector<32x8xf32>
    %48 = arith.mulf %47, %46 : vector<32x8xf32>
    %49 = arith.addf %43, %48 : vector<32x8xf32>
    %50 = vector.extract_strided_slice %12 {offsets = [0, 6], sizes = [1, 1], strides = [1, 1]} : vector<1x8xf32> to vector<1x1xf32>
    %c6 = arith.constant 6 : index
    %c0_22 = arith.constant 0 : index
    %c0_23 = arith.constant 0 : index
    %51 = vector.load %arg3[%c6, %c0_22, %c0_23] : memref<8x32x8xf32, #tpu.memory_space<vmem>>, vector<1x32x8xf32>
    %52 = vector.shape_cast %51 : vector<1x32x8xf32> to vector<32x8xf32>
    %53 = vector.broadcast %50 : vector<1x1xf32> to vector<32x8xf32>
    %54 = arith.mulf %53, %52 : vector<32x8xf32>
    %55 = arith.addf %49, %54 : vector<32x8xf32>
    %56 = vector.extract_strided_slice %12 {offsets = [0, 7], sizes = [1, 1], strides = [1, 1]} : vector<1x8xf32> to vector<1x1xf32>
    %c7 = arith.constant 7 : index
    %c0_24 = arith.constant 0 : index
    %c0_25 = arith.constant 0 : index
    %57 = vector.load %arg3[%c7, %c0_24, %c0_25] : memref<8x32x8xf32, #tpu.memory_space<vmem>>, vector<1x32x8xf32>
    %58 = vector.shape_cast %57 : vector<1x32x8xf32> to vector<32x8xf32>
    %59 = vector.broadcast %56 : vector<1x1xf32> to vector<32x8xf32>
    %60 = arith.mulf %59, %58 : vector<32x8xf32>
    %61 = arith.addf %55, %60 : vector<32x8xf32>
    %c0_26 = arith.constant 0 : index
    %c0_27 = arith.constant 0 : index
    %62 = vector.load %arg4[%c0_26, %c0_27] : memref<32x32xbf16, #tpu.memory_space<vmem>>, vector<32x32xbf16>
    %63 = arith.truncf %3 : vector<32x8xf32> to vector<32x8xbf16>
    %cst_28 = arith.constant dense<0.000000e+00> : vector<32x8xf32>
    %64 = tpu.matmul %62, %63, %cst_28 {dimension_numbers = #tpu.dot_dimension_numbers<[1], [0], [0], [1], [0, 0, 1, 1], [], []>} : vector<32x32xbf16>, vector<32x8xbf16>, vector<32x8xf32> -> vector<32x8xf32>
    %65 = arith.addf %61, %64 : vector<32x8xf32>
    %c0_29 = arith.constant 0 : index
    %c0_30 = arith.constant 0 : index
    %66 = vector.load %arg5[%c0_29, %c0_30] : memref<32x1xf32, #tpu.memory_space<vmem>>, vector<32x1xf32>
    %67 = vector.broadcast %66 : vector<32x1xf32> to vector<32x8xf32>
    %68 = arith.addf %65, %67 : vector<32x8xf32>
    %cst_31 = arith.constant 0.000000e+00 : f32
    %69 = vector.broadcast %cst_31 : f32 to vector<32x8xf32>
    %70 = arith.maximumf %68, %69 : vector<32x8xf32>
    %c0_32 = arith.constant 0 : index
    %c0_33 = arith.constant 0 : index
    %71 = vector.load %arg6[%c0_32, %c0_33] : memref<32x32xbf16, #tpu.memory_space<vmem>>, vector<32x32xbf16>
    %72 = arith.truncf %70 : vector<32x8xf32> to vector<32x8xbf16>
    %cst_34 = arith.constant dense<0.000000e+00> : vector<32x8xf32>
    %73 = tpu.matmul %71, %72, %cst_34 {dimension_numbers = #tpu.dot_dimension_numbers<[1], [0], [0], [1], [0, 0, 1, 1], [], []>} : vector<32x32xbf16>, vector<32x8xbf16>, vector<32x8xf32> -> vector<32x8xf32>
    %c0_35 = arith.constant 0 : index
    %c0_36 = arith.constant 0 : index
    %74 = vector.load %arg7[%c0_35, %c0_36] : memref<32x1xf32, #tpu.memory_space<vmem>>, vector<32x1xf32>
    %75 = vector.broadcast %74 : vector<32x1xf32> to vector<32x8xf32>
    %76 = arith.addf %73, %75 : vector<32x8xf32>
    %cst_37 = arith.constant dense<0.000000e+00> : vector<32xf32>
    %77 = vector.multi_reduction <add>, %76, %cst_37 [1] : vector<32x8xf32> to vector<32xf32>
    %78 = vector.shape_cast %77 : vector<32xf32> to vector<32x1xf32>
    %79 = arith.addf %1, %78 : vector<32x1xf32>
    %c1_38 = arith.constant 1 : index
    %c0_39 = arith.constant 0 : index
    %c0_40 = arith.constant 0 : index
    %80 = vector.load %arg0[%c1_38, %c0_39, %c0_40] : memref<2x32x8xf32, #tpu.memory_space<vmem>>, vector<1x32x8xf32>
    %81 = vector.shape_cast %80 : vector<1x32x8xf32> to vector<32x8xf32>
    %c0_41 = arith.constant 0 : index
    %c0_42 = arith.constant 0 : index
    %82 = vector.load %arg1[%c0_41, %c0_42] : memref<32x1xf32, #tpu.memory_space<vmem>>, vector<32x1xf32>
    %83 = vector.broadcast %82 : vector<32x1xf32> to vector<32x8xf32>
    %84 = arith.mulf %81, %83 : vector<32x8xf32>
    %cst_43 = arith.constant dense<0.000000e+00> : vector<8xf32>
    %85 = vector.multi_reduction <add>, %84, %cst_43 [0] : vector<32x8xf32> to vector<8xf32>
    %86 = vector.shape_cast %85 : vector<8xf32> to vector<1x8xf32>
    %87 = vector.broadcast %0 : f32 to vector<1x8xf32>
    %88 = arith.addf %86, %87 : vector<1x8xf32>
    %cst_44 = arith.constant 0.000000e+00 : f32
    %89 = vector.broadcast %cst_44 : f32 to vector<1x8xf32>
    %90 = arith.maximumf %88, %89 : vector<1x8xf32>
    %cst_45 = arith.constant 0.000000e+00 : f32
    %91 = vector.broadcast %cst_45 : f32 to vector<32x8xf32>
    %92 = vector.extract_strided_slice %90 {offsets = [0, 0], sizes = [1, 1], strides = [1, 1]} : vector<1x8xf32> to vector<1x1xf32>
    %c0_46 = arith.constant 0 : index
    %c0_47 = arith.constant 0 : index
    %c0_48 = arith.constant 0 : index
    %93 = vector.load %arg3[%c0_46, %c0_47, %c0_48] : memref<8x32x8xf32, #tpu.memory_space<vmem>>, vector<1x32x8xf32>
    %94 = vector.shape_cast %93 : vector<1x32x8xf32> to vector<32x8xf32>
    %95 = vector.broadcast %92 : vector<1x1xf32> to vector<32x8xf32>
    %96 = arith.mulf %95, %94 : vector<32x8xf32>
    %97 = arith.addf %91, %96 : vector<32x8xf32>
    %98 = vector.extract_strided_slice %90 {offsets = [0, 1], sizes = [1, 1], strides = [1, 1]} : vector<1x8xf32> to vector<1x1xf32>
    %c1_49 = arith.constant 1 : index
    %c0_50 = arith.constant 0 : index
    %c0_51 = arith.constant 0 : index
    %99 = vector.load %arg3[%c1_49, %c0_50, %c0_51] : memref<8x32x8xf32, #tpu.memory_space<vmem>>, vector<1x32x8xf32>
    %100 = vector.shape_cast %99 : vector<1x32x8xf32> to vector<32x8xf32>
    %101 = vector.broadcast %98 : vector<1x1xf32> to vector<32x8xf32>
    %102 = arith.mulf %101, %100 : vector<32x8xf32>
    %103 = arith.addf %97, %102 : vector<32x8xf32>
    %104 = vector.extract_strided_slice %90 {offsets = [0, 2], sizes = [1, 1], strides = [1, 1]} : vector<1x8xf32> to vector<1x1xf32>
    %c2_52 = arith.constant 2 : index
    %c0_53 = arith.constant 0 : index
    %c0_54 = arith.constant 0 : index
    %105 = vector.load %arg3[%c2_52, %c0_53, %c0_54] : memref<8x32x8xf32, #tpu.memory_space<vmem>>, vector<1x32x8xf32>
    %106 = vector.shape_cast %105 : vector<1x32x8xf32> to vector<32x8xf32>
    %107 = vector.broadcast %104 : vector<1x1xf32> to vector<32x8xf32>
    %108 = arith.mulf %107, %106 : vector<32x8xf32>
    %109 = arith.addf %103, %108 : vector<32x8xf32>
    %110 = vector.extract_strided_slice %90 {offsets = [0, 3], sizes = [1, 1], strides = [1, 1]} : vector<1x8xf32> to vector<1x1xf32>
    %c3_55 = arith.constant 3 : index
    %c0_56 = arith.constant 0 : index
    %c0_57 = arith.constant 0 : index
    %111 = vector.load %arg3[%c3_55, %c0_56, %c0_57] : memref<8x32x8xf32, #tpu.memory_space<vmem>>, vector<1x32x8xf32>
    %112 = vector.shape_cast %111 : vector<1x32x8xf32> to vector<32x8xf32>
    %113 = vector.broadcast %110 : vector<1x1xf32> to vector<32x8xf32>
    %114 = arith.mulf %113, %112 : vector<32x8xf32>
    %115 = arith.addf %109, %114 : vector<32x8xf32>
    %116 = vector.extract_strided_slice %90 {offsets = [0, 4], sizes = [1, 1], strides = [1, 1]} : vector<1x8xf32> to vector<1x1xf32>
    %c4_58 = arith.constant 4 : index
    %c0_59 = arith.constant 0 : index
    %c0_60 = arith.constant 0 : index
    %117 = vector.load %arg3[%c4_58, %c0_59, %c0_60] : memref<8x32x8xf32, #tpu.memory_space<vmem>>, vector<1x32x8xf32>
    %118 = vector.shape_cast %117 : vector<1x32x8xf32> to vector<32x8xf32>
    %119 = vector.broadcast %116 : vector<1x1xf32> to vector<32x8xf32>
    %120 = arith.mulf %119, %118 : vector<32x8xf32>
    %121 = arith.addf %115, %120 : vector<32x8xf32>
    %122 = vector.extract_strided_slice %90 {offsets = [0, 5], sizes = [1, 1], strides = [1, 1]} : vector<1x8xf32> to vector<1x1xf32>
    %c5_61 = arith.constant 5 : index
    %c0_62 = arith.constant 0 : index
    %c0_63 = arith.constant 0 : index
    %123 = vector.load %arg3[%c5_61, %c0_62, %c0_63] : memref<8x32x8xf32, #tpu.memory_space<vmem>>, vector<1x32x8xf32>
    %124 = vector.shape_cast %123 : vector<1x32x8xf32> to vector<32x8xf32>
    %125 = vector.broadcast %122 : vector<1x1xf32> to vector<32x8xf32>
    %126 = arith.mulf %125, %124 : vector<32x8xf32>
    %127 = arith.addf %121, %126 : vector<32x8xf32>
    %128 = vector.extract_strided_slice %90 {offsets = [0, 6], sizes = [1, 1], strides = [1, 1]} : vector<1x8xf32> to vector<1x1xf32>
    %c6_64 = arith.constant 6 : index
    %c0_65 = arith.constant 0 : index
    %c0_66 = arith.constant 0 : index
    %129 = vector.load %arg3[%c6_64, %c0_65, %c0_66] : memref<8x32x8xf32, #tpu.memory_space<vmem>>, vector<1x32x8xf32>
    %130 = vector.shape_cast %129 : vector<1x32x8xf32> to vector<32x8xf32>
    %131 = vector.broadcast %128 : vector<1x1xf32> to vector<32x8xf32>
    %132 = arith.mulf %131, %130 : vector<32x8xf32>
    %133 = arith.addf %127, %132 : vector<32x8xf32>
    %134 = vector.extract_strided_slice %90 {offsets = [0, 7], sizes = [1, 1], strides = [1, 1]} : vector<1x8xf32> to vector<1x1xf32>
    %c7_67 = arith.constant 7 : index
    %c0_68 = arith.constant 0 : index
    %c0_69 = arith.constant 0 : index
    %135 = vector.load %arg3[%c7_67, %c0_68, %c0_69] : memref<8x32x8xf32, #tpu.memory_space<vmem>>, vector<1x32x8xf32>
    %136 = vector.shape_cast %135 : vector<1x32x8xf32> to vector<32x8xf32>
    %137 = vector.broadcast %134 : vector<1x1xf32> to vector<32x8xf32>
    %138 = arith.mulf %137, %136 : vector<32x8xf32>
    %139 = arith.addf %133, %138 : vector<32x8xf32>
    %c0_70 = arith.constant 0 : index
    %c0_71 = arith.constant 0 : index
    %140 = vector.load %arg4[%c0_70, %c0_71] : memref<32x32xbf16, #tpu.memory_space<vmem>>, vector<32x32xbf16>
    %141 = arith.truncf %81 : vector<32x8xf32> to vector<32x8xbf16>
    %cst_72 = arith.constant dense<0.000000e+00> : vector<32x8xf32>
    %142 = tpu.matmul %140, %141, %cst_72 {dimension_numbers = #tpu.dot_dimension_numbers<[1], [0], [0], [1], [0, 0, 1, 1], [], []>} : vector<32x32xbf16>, vector<32x8xbf16>, vector<32x8xf32> -> vector<32x8xf32>
    %143 = arith.addf %139, %142 : vector<32x8xf32>
    %c0_73 = arith.constant 0 : index
    %c0_74 = arith.constant 0 : index
    %144 = vector.load %arg5[%c0_73, %c0_74] : memref<32x1xf32, #tpu.memory_space<vmem>>, vector<32x1xf32>
    %145 = vector.broadcast %144 : vector<32x1xf32> to vector<32x8xf32>
    %146 = arith.addf %143, %145 : vector<32x8xf32>
    %cst_75 = arith.constant 0.000000e+00 : f32
    %147 = vector.broadcast %cst_75 : f32 to vector<32x8xf32>
    %148 = arith.maximumf %146, %147 : vector<32x8xf32>
    %c0_76 = arith.constant 0 : index
    %c0_77 = arith.constant 0 : index
    %149 = vector.load %arg6[%c0_76, %c0_77] : memref<32x32xbf16, #tpu.memory_space<vmem>>, vector<32x32xbf16>
    %150 = arith.truncf %148 : vector<32x8xf32> to vector<32x8xbf16>
    %cst_78 = arith.constant dense<0.000000e+00> : vector<32x8xf32>
    %151 = tpu.matmul %149, %150, %cst_78 {dimension_numbers = #tpu.dot_dimension_numbers<[1], [0], [0], [1], [0, 0, 1, 1], [], []>} : vector<32x32xbf16>, vector<32x8xbf16>, vector<32x8xf32> -> vector<32x8xf32>
    %c0_79 = arith.constant 0 : index
    %c0_80 = arith.constant 0 : index
    %152 = vector.load %arg7[%c0_79, %c0_80] : memref<32x1xf32, #tpu.memory_space<vmem>>, vector<32x1xf32>
    %153 = vector.broadcast %152 : vector<32x1xf32> to vector<32x8xf32>
    %154 = arith.addf %151, %153 : vector<32x8xf32>
    %cst_81 = arith.constant dense<0.000000e+00> : vector<32xf32>
    %155 = vector.multi_reduction <add>, %154, %cst_81 [1] : vector<32x8xf32> to vector<32xf32>
    %156 = vector.shape_cast %155 : vector<32xf32> to vector<32x1xf32>
    %157 = arith.addf %79, %156 : vector<32x1xf32>
    %cst_82 = arith.constant 6.250000e-02 : f32
    %158 = vector.broadcast %cst_82 : f32 to vector<32x1xf32>
    %159 = arith.mulf %157, %158 : vector<32x1xf32>
    %cst_83 = arith.constant 0.000000e+00 : f32
    %160 = vector.broadcast %cst_83 : f32 to vector<32x1xf32>
    %161 = vector.broadcast %159 : vector<32x1xf32> to vector<32x8xf32>
    %162 = arith.subf %76, %161 : vector<32x8xf32>
    %163 = arith.mulf %162, %162 : vector<32x8xf32>
    %cst_84 = arith.constant dense<0.000000e+00> : vector<32xf32>
    %164 = vector.multi_reduction <add>, %163, %cst_84 [1] : vector<32x8xf32> to vector<32xf32>
    %165 = vector.shape_cast %164 : vector<32xf32> to vector<32x1xf32>
    %166 = arith.addf %160, %165 : vector<32x1xf32>
    %167 = vector.broadcast %159 : vector<32x1xf32> to vector<32x8xf32>
    %168 = arith.subf %154, %167 : vector<32x8xf32>
    %169 = arith.mulf %168, %168 : vector<32x8xf32>
    %cst_85 = arith.constant dense<0.000000e+00> : vector<32xf32>
    %170 = vector.multi_reduction <add>, %169, %cst_85 [1] : vector<32x8xf32> to vector<32xf32>
    %171 = vector.shape_cast %170 : vector<32xf32> to vector<32x1xf32>
    %172 = arith.addf %166, %171 : vector<32x1xf32>
    %cst_86 = arith.constant 6.250000e-02 : f32
    %173 = vector.broadcast %cst_86 : f32 to vector<32x1xf32>
    %174 = arith.mulf %172, %173 : vector<32x1xf32>
    %c0_87 = arith.constant 0 : index
    %c0_88 = arith.constant 0 : index
    %175 = vector.load %arg8[%c0_87, %c0_88] : memref<32x1xf32, #tpu.memory_space<vmem>>, vector<32x1xf32>
    %cst_89 = arith.constant 9.99999974E-6 : f32
    %176 = vector.broadcast %cst_89 : f32 to vector<32x1xf32>
    %177 = arith.addf %174, %176 : vector<32x1xf32>
    %178 = math.rsqrt %177 : vector<32x1xf32>
    %179 = arith.mulf %175, %178 : vector<32x1xf32>
    %c0_90 = arith.constant 0 : index
    %c0_91 = arith.constant 0 : index
    %180 = vector.load %arg9[%c0_90, %c0_91] : memref<32x1xf32, #tpu.memory_space<vmem>>, vector<32x1xf32>
    %181 = arith.mulf %159, %179 : vector<32x1xf32>
    %182 = arith.subf %180, %181 : vector<32x1xf32>
    %183 = vector.broadcast %179 : vector<32x1xf32> to vector<32x8xf32>
    %184 = arith.mulf %76, %183 : vector<32x8xf32>
    %185 = vector.broadcast %182 : vector<32x1xf32> to vector<32x8xf32>
    %186 = arith.addf %184, %185 : vector<32x8xf32>
    %c0_92 = arith.constant 0 : index
    %c0_93 = arith.constant 0 : index
    %c0_94 = arith.constant 0 : index
    %187 = vector.load %arg10[%c0_92, %c0_93, %c0_94] : memref<2x32x8xf32, #tpu.memory_space<vmem>>, vector<1x32x8xf32>
    %188 = vector.shape_cast %187 : vector<1x32x8xf32> to vector<32x8xf32>
    %189 = vector.shape_cast %186 : vector<32x8xf32> to vector<1x32x8xf32>
    tpu.vector_store %arg10[%c0_92, %c0_93, %c0_94], %189 {strides = array<i32>} : memref<2x32x8xf32, #tpu.memory_space<vmem>>, vector<1x32x8xf32>,
    %190 = vector.broadcast %179 : vector<32x1xf32> to vector<32x8xf32>
    %191 = arith.mulf %154, %190 : vector<32x8xf32>
    %192 = vector.broadcast %182 : vector<32x1xf32> to vector<32x8xf32>
    %193 = arith.addf %191, %192 : vector<32x8xf32>
    %c1_95 = arith.constant 1 : index
    %c0_96 = arith.constant 0 : index
    %c0_97 = arith.constant 0 : index
    %194 = vector.load %arg10[%c1_95, %c0_96, %c0_97] : memref<2x32x8xf32, #tpu.memory_space<vmem>>, vector<1x32x8xf32>
    %195 = vector.shape_cast %194 : vector<1x32x8xf32> to vector<32x8xf32>
    %196 = vector.shape_cast %193 : vector<32x8xf32> to vector<1x32x8xf32>
    tpu.vector_store %arg10[%c1_95, %c0_96, %c0_97], %196 {strides = array<i32>} : memref<2x32x8xf32, #tpu.memory_space<vmem>>, vector<1x32x8xf32>,
    return
  }
}

</mosaic_0001>

<bundles_post_ra>
// kernel: tpu_custom_call.1
= control target key start
LH: loop header
LB: loop body
LE: loop exit
PB: predicated region body
PF: predicated region fallthrough
CT: control target
= control target key end

     0   :  { %v981_v0 = vmov 0   ;;  %vm239_vm0 = vcmask 261120   ;;  %v982_v21 = vmov 1   ;;  %vm70_vm1 = vcmask 64512   ;;  %s1514_s1 = inlined_call_operand.vmem [shape: f32[32,1], index: 1, kind: input, shape index: {}]   ;;  %s1515_s0 = inlined_call_operand.vmem [shape: f32[2,32,8], index: 0, kind: input, shape index: {}]   ;;  %s1516_s4 = inlined_call_operand.vmem [shape: bf16[32,32], index: 4, kind: input, shape index: {}]   ;;  %s1517_s5 = inlined_call_operand.vmem [shape: f32[32,1], index: 5, kind: input, shape index: {}]   ;;  %s1518_s2 = inlined_call_operand.<no memory space> [shape: f32[1,1], index: 2, kind: input, shape index: {}]   ;;  %s1519_s7 = inlined_call_operand.vmem [shape: f32[32,1], index: 7, kind: input, shape index: {}]   ;;  %s1520_s6 = inlined_call_operand.vmem [shape: bf16[32,32], index: 6, kind: input, shape index: {}]   ;;  %s1521_s3 = inlined_call_operand.vmem [shape: f32[8,32,8], index: 3, kind: input, shape index: {}]   ;;  %s1522_s8 = inlined_call_operand.vmem [shape: f32[32,1], index: 8, kind: input, shape index: {}]   ;;  %s1523_s9 = inlined_call_operand.vmem [shape: f32[32,1], index: 9, kind: input, shape index: {}]   ;;  %s1524_s10 = inlined_call_operand.vmem [shape: f32[2,32,8], index: 10, kind: output, shape index: {}]  }
   0x1   :  { %951 = vset.pattern.permute.xlu1 %v981_v0  ;;  %950 = vset.pattern.permute.xlu0 %v981_v0  ;;  %v44_v1 = vld [vmem:[%s1514_s1 + $0x10] sm:$0xff]  ;;  %v42_v2 = vld [vmem:[%s1514_s1] sm:$0xff]  ;;  %v45_v3 = vld [vmem:[%s1514_s1 + $0x18] sm:$0xff]  ;;  %v84_v55 = vstv %s1518_s2  ;;  %v983_v62 = vmov 3   ;;  %v984_v63 = vmov 2  }
   0x2   :  { %58 = vperm.xlu1 %951, %v44_v1   ;;  %48 = vperm.xlu0 %950, %v42_v2   ;;  %v43_v4 = vld [vmem:[%s1514_s1 + $0x8] sm:$0xff]  ;;  %v40_v5 = vld [vmem:[%s1515_s0 + $0x10] sm:$0xff]  ;;  %v41_v6 = vld [vmem:[%s1515_s0 + $0x18] sm:$0xff] }
   0x3   :  { %v38_v7 = vld [vmem:[%s1515_s0] sm:$0xff]  ;;  %v228_v8 = vpack.c.bf16 %v41_v6, %v40_v5  ;;  %v39_v9 = vld [vmem:[%s1515_s0 + $0x8] sm:$0xff]  ;;  %v884_v12 = vld [vmem:[%s1515_s0 + $0x30] sm:$0xff] }
   0x4   :  { %v227_v10 = vpack.c.bf16 %v39_v9, %v38_v7  ;;  %v969_v11 = vld [vmem:[%s1516_s4] sm:$0xff]   ;;  %v885_v13 = vld [vmem:[%s1515_s0 + $0x38] sm:$0xff]  ;;  %v301_v15 = vld [vmem:[%s1517_s5 + $0x10] sm:$0xff] }
   0x5   :  { %v302_v14 = vld [vmem:[%s1517_s5 + $0x18] sm:$0xff]  ;;  %910 = vmatprep.subr.bf16.mxu0 %v228_v8  ;;  %914 = vmatprep.mubr.msk.bf16.mxu0 %vm239_vm0, %v969_v11  ;;  %v564_v16 = vpack.c.bf16 %v885_v13, %v884_v12  ;;  %v882_v17 = vld [vmem:[%s1515_s0 + $0x20] sm:$0xff]  ;;  %v883_v18 = vld [vmem:[%s1515_s0 + $0x28] sm:$0xff] }
   0x6   :  { %63 = vperm.xlu1 %951, %v45_v3   ;;  %53 = vperm.xlu0 %950, %v43_v4   ;;  %v970_v19 = vld [vmem:[%s1516_s4 + $0x8] sm:$0xff]   ;;  %v563_v20 = vpack.c.bf16 %v883_v18, %v882_v17  ;;  %v985_v3 = vmov 4   ;;  %v986_v4 = vmov 5  }
   0x7   :  { %911 = vmatpush3.bf16.msra.mxu0 %v228_v8  ;;  %v299_v8 = vld [vmem:[%s1517_s5] sm:$0xff] }
   0x8   :  { %912 = vmatprep.subr.bf16.mxu0 %v227_v10 }
   0xa   :  { %320 = vperm.xlu1 %951, %v302_v14   ;;  %315 = vperm.xlu0 %950, %v301_v15  }
   0xb   :  { %913 = vmatpush3.bf16.msra.mxu0 %v227_v10  ;;  %v338_v10 = vld [vmem:[%s1519_s7 + $0x8] sm:$0xff] }
   0xc   :  { %926 = vmatprep.subr.bf16.mxu0 %v564_v16 }
   0xe   :  { %915 = vmatmul.mubr.msk.bf16.vlgmr.msra.gmra.mxu0 %vm239_vm0, %v970_v19  ;;  %952 = vset.pattern.permute.xlu1 %v982_v21 }
   0xf   :  { %927 = vmatpush3.bf16.msra.mxu0 %v564_v16  ;;  %930 = vmatprep.mubr.msk.bf16.mxu0 %vm239_vm0, %v969_v11  ;;  %v339_v11 = vld [vmem:[%s1519_s7 + $0x10] sm:$0xff] }
  0x10   :  { %928 = vmatprep.subr.bf16.mxu0 %v563_v20 }
  0x13   :  { %929 = vmatpush3.bf16.msra.mxu0 %v563_v20  ;;  %v1151_v20 = vld [vmem:[%s1521_s3 + $0x38] sm:$0xff] }
  0x16   :  { %931 = vmatmul.mubr.msk.bf16.vlgmr.msra.gmra.mxu0 %vm239_vm0, %v970_v19 }
  0x7d   :  { %v59_v22 = vpop.permute.xlu1 %58  ;;  %v49_v23 = vpop.permute.xlu0 %48 }
  0x7e   :  { %v66_v24 = vmul.f32 %v49_v23, %v38_v7  ;;  %v447_v25 = vmul.f32 %v882_v17, %v49_v23  ;;  %v68_v28 = vmul.f32 %v59_v22, %v40_v5  ;;  %v449_v29 = vmul.f32 %v884_v12, %v59_v22  ;;  %v1129_v12 = vld [vmem:[%s1520_s6] sm:$0xff]   ;;  %v1161_v22 = vld [vmem:[%s1521_s3 + $0x18] sm:$0xff]  ;;  %v1166_v23 = vld [vmem:[%s1521_s3 + $0x50] sm:$0xff] }
  0x7f   :  { %v988_v7 = vmov 7   ;;  %922 = vmatprep.mubr.msk.bf16.mxu1 %vm239_vm0, %v1129_v12 }
  0x80   :  { %v71_v32 = vsel %vm70_vm1, %v66_v24, 0.0  ;;  %v451_v33 = vsel %vm70_vm1, %v447_v25, 0.0  ;;  %v74_v40 = vsel %vm70_vm1, %v68_v28, 0.0  ;;  %v454_v41 = vsel %vm70_vm1, %v449_v29, 0.0  ;;  %v1171_v24 = vld [vmem:[%s1521_s3 + $0x58] sm:$0xff] }
  0x81   :  { %v64_v26 = vpop.permute.xlu1 %63  ;;  %v54_v27 = vpop.permute.xlu0 %53 }
  0x82   :  { %v67_v30 = vmul.f32 %v54_v27, %v39_v9  ;;  %v448_v31 = vmul.f32 %v883_v18, %v54_v27  ;;  %v69_v34 = vmul.f32 %v64_v26, %v41_v6  ;;  %v450_v35 = vmul.f32 %v885_v13, %v64_v26  ;;  %v300_v9 = vld [vmem:[%s1517_s5 + $0x8] sm:$0xff]  ;;  %v340_v13 = vld [vmem:[%s1519_s7 + $0x18] sm:$0xff]  ;;  %v1146_v18 = vld [vmem:[%s1521_s3 + $0x30] sm:$0xff] }
  0x83   :  { %v987_v6 = vmov 6  }
  0x84   :  { %v72_v36 = vsel %vm70_vm1, %v67_v30, 0.0  ;;  %v452_v37 = vsel %vm70_vm1, %v448_v31, 0.0  ;;  %v76_v44 = vsel %vm70_vm1, %v69_v34, 0.0  ;;  %v456_v45 = vsel %vm70_vm1, %v450_v35, 0.0  ;;  %v1180_v30 = vld [vmem:[%s1521_s3 + $0x20] sm:$0xff]  ;;  %v1195_v34 = vld [vmem:[%s1521_s3 + $0x8] sm:$0xff] }
  0x85   :  { %v73_v38 = vadd.f32 %v72_v36, %v71_v32  ;;  %v453_v39 = vadd.f32 %v452_v37, %v451_v33  ;;  %v1139_v14 = vpop.permute.xlu1 %320  ;;  %v1141_v15 = vpop.permute.xlu0 %315  ;;  %v1185_v32 = vld [vmem:[%s1521_s3 + $0x28] sm:$0xff]  ;;  %v1190_v33 = vld [vmem:[%s1521_s3] sm:$0xff] }
  0x87   :  { %v75_v42 = vadd.f32 %v74_v40, %v73_v38  ;;  %v455_v43 = vadd.f32 %v454_v41, %v453_v39  ;;  %v1202_v39 = vld [vmem:[%s1521_s3 + $0x40] sm:$0xff]  ;;  %v1207_v40 = vld [vmem:[%s1521_s3 + $0x48] sm:$0xff] }
  0x89   :  { %v77_v46 = vadd.f32 %v76_v44, %v75_v42  ;;  %v457_v47 = vadd.f32 %v456_v45, %v455_v43  ;;  %v1216_v45 = vld [vmem:[%s1521_s3 + $0x70] sm:$0xff] }
  0x8b   :  { %v78_v48 = vrot.slane %v77_v46, 4  ;;  %v458_v49 = vrot.slane %v457_v47, 4 }
  0x8d   :  { %v79_v50 = vadd.f32 %v78_v48, %v77_v46  ;;  %v459_v52 = vadd.f32 %v458_v49, %v457_v47  ;;  %v1221_v46 = vld [vmem:[%s1521_s3 + $0x78] sm:$0xff] }
  0x8f   :  { %v80_v51 = vrot.slane %v79_v50, 2  ;;  %v460_v56 = vrot.slane %v459_v52, 2 }
  0x91   :  { %v81_v53 = vadd.f32 %v80_v51, %v79_v50  ;;  %v461_v59 = vadd.f32 %v460_v56, %v459_v52  ;;  %v1228_v52 = vld [vmem:[%s1521_s3 + $0x90] sm:$0xff] }
  0x93   :  { %v82_v54 = vrot.slane %v81_v53, 1  ;;  %v462_v61 = vrot.slane %v461_v59, 1 }
  0x95   :  { %v83_v57 = vadd.f32 %v82_v54, %v81_v53  ;;  %v463_v1 = vadd.f32 %v462_v61, %v461_v59  ;;  %v1233_v53 = vld [vmem:[%s1521_s3 + $0x98] sm:$0xff]  ;;  %v1240_v59 = vld [vmem:[%s1521_s3 + $0x60] sm:$0xff] }
  0x97   :  { %v85_v58 = vadd.f32 %v84_v55, %v83_v57  ;;  %v464_v2 = vadd.f32 %v463_v1, %v84_v55 }
  0x99   :  { %v86_v60 = vmax.f32 %v85_v58, 0.0  ;;  %v465_v5 = vmax.f32 %v464_v2, 0.0 }
  0x9b   :  { %110 = vperm.xlu1 %952, %v86_v60   ;;  %93 = vperm.xlu0 %950, %v86_v60  }
  0x9f   :  { %954 = vset.pattern.permute.xlu1 %v983_v62  ;;  %953 = vset.pattern.permute.xlu0 %v984_v63 }
  0xa0   :  { %144 = vperm.xlu1 %954, %v86_v60   ;;  %127 = vperm.xlu0 %953, %v86_v60  }
  0xa4   :  { %955 = vset.pattern.permute.xlu1 %v985_v3  ;;  %956 = vset.pattern.permute.xlu0 %v986_v4 }
  0xa5   :  { %161 = vperm.xlu1 %955, %v86_v60   ;;  %178 = vperm.xlu0 %956, %v86_v60  }
  0xa9   :  { %957 = vset.pattern.permute.xlu1 %v981_v0  ;;  %959 = vset.pattern.permute.xlu0 %v987_v6 }
  0xaa   :  { %468 = vperm.xlu1 %957, %v465_v5   ;;  %195 = vperm.xlu0 %959, %v86_v60  }
  0xae   :  { %958 = vset.pattern.permute.xlu1 %v982_v21  ;;  %962 = vset.pattern.permute.xlu0 %v983_v62  ;;  %v1156_v21 = vld [vmem:[%s1521_s3 + $0x10] sm:$0xff] }
  0xaf   :  { %480 = vperm.xlu1 %958, %v465_v5   ;;  %504 = vperm.xlu0 %962, %v465_v5  }
  0xb3   :  { %960 = vset.pattern.permute.xlu1 %v984_v63  ;;  %966 = vset.pattern.permute.xlu0 %v988_v7 }
  0xb4   :  { %492 = vperm.xlu1 %960, %v465_v5   ;;  %552 = vperm.xlu0 %966, %v465_v5  }
  0xb8   :  { %961 = vset.pattern.permute.xlu1 %v988_v7  ;;  %968 = vset.pattern.permute.xlu0 %v981_v0 }
  0xb9   :  { %212 = vperm.xlu1 %961, %v86_v60   ;;  %v1245_v60 = vld [vmem:[%s1521_s3 + $0x68] sm:$0xff] }
  0xbd   :  { %963 = vset.pattern.permute.xlu1 %v985_v3 }
  0xbe   :  { %516 = vperm.xlu1 %963, %v465_v5  }
  0xc2   :  { %964 = vset.pattern.permute.xlu1 %v986_v4 }
  0xc3   :  { %528 = vperm.xlu1 %964, %v465_v5  }
  0xc7   :  { %965 = vset.pattern.permute.xlu1 %v987_v6  ;;  %v1257_v6 = vld [vmem:[%s1521_s3 + $0x88] sm:$0xff] }
  0xc8   :  { %540 = vperm.xlu1 %965, %v465_v5   ;;  %v1252_v5 = vld [vmem:[%s1521_s3 + $0x80] sm:$0xff] }
  0xcc   :  { %967 = vset.pattern.permute.xlu1 %v981_v0  ;;  %v337_v0 = vld [vmem:[%s1519_s7] sm:$0xff] }
  0xcd   :  { %305 = vperm.xlu1 %967, %v299_v8   ;;  %343 = vperm.xlu0 %968, %v337_v0  }
  0xd1   :  { %310 = vperm.xlu1 %967, %v300_v9   ;;  %358 = vperm.xlu0 %968, %v340_v13   ;;  %v1264_v9 = vld [vmem:[%s1521_s3 + $0xb0] sm:$0xff]  ;;  %v1274_v13 = vld [vmem:[%s1521_s3 + $0xa0] sm:$0xff] }
  0xd5   :  { %348 = vperm.xlu1 %967, %v338_v10   ;;  %v1269_v10 = vld [vmem:[%s1521_s3 + $0xb8] sm:$0xff] }
  0xd9   :  { %353 = vperm.xlu1 %967, %v339_v11  }
 0x116   :  { %v111_v16 = vpop.permute.xlu1 %110  ;;  %v94_v17 = vpop.permute.xlu0 %93 }
 0x117   :  { %v115_v26 = vmul.f32 %v1146_v18, %v111_v16  ;;  %v116_v27 = vmul.f32 %v1151_v20, %v111_v16  ;;  %v98_v28 = vmul.f32 %v94_v17, %v1156_v21  ;;  %v99_v29 = vmul.f32 %v94_v17, %v1161_v22 }
 0x118   :  { %v113_v41 = vmul.f32 %v1180_v30, %v111_v16  ;;  %v114_v42 = vmul.f32 %v1185_v32, %v111_v16  ;;  %v96_v43 = vmul.f32 %v94_v17, %v1190_v33  ;;  %v97_v44 = vmul.f32 %v94_v17, %v1195_v34 }
 0x119   :  { %v119_v37 = vadd.f32 %v115_v26, %v98_v28  ;;  %v120_v38 = vadd.f32 %v116_v27, %v99_v29  ;;  %v1281_v26 = vld [vmem:[%s1521_s3 + $0xd0] sm:$0xff]  ;;  %v1286_v27 = vld [vmem:[%s1521_s3 + $0xd8] sm:$0xff]  ;;  %v916_v29 = vpop.f32.mrf.mxu0 }
 0x11a   :  { %v117_v56 = vadd.f32 %v113_v41, %v96_v43  ;;  %v118_v57 = vadd.f32 %v114_v42, %v97_v44 }
 0x11b   :  { %v145_v19 = vpop.permute.xlu1 %144  ;;  %v128_v25 = vpop.permute.xlu0 %127 }
 0x11c   :  { %v132_v35 = vmul.f32 %v1166_v23, %v128_v25  ;;  %v133_v36 = vmul.f32 %v1171_v24, %v128_v25  ;;  %v130_v50 = vmul.f32 %v1202_v39, %v128_v25  ;;  %v131_v51 = vmul.f32 %v1207_v40, %v128_v25 }
 0x11d   :  { %v149_v54 = vmul.f32 %v1216_v45, %v145_v19  ;;  %v150_v55 = vmul.f32 %v1221_v46, %v145_v19  ;;  %v147_v7 = vmul.f32 %v1240_v59, %v145_v19  ;;  %v148_v8 = vmul.f32 %v1245_v60, %v145_v19 }
 0x11e   :  { %v136_v47 = vadd.f32 %v132_v35, %v119_v37  ;;  %v137_v48 = vadd.f32 %v133_v36, %v120_v38  ;;  %v134_v2 = vadd.f32 %v130_v50, %v117_v56  ;;  %v135_v3 = vadd.f32 %v131_v51, %v118_v57  ;;  %v1291_v35 = vld [vmem:[%s1521_s3 + $0xa8] sm:$0xff] }
 0x120   :  { %v162_v31 = vpop.permute.xlu1 %161  ;;  %v179_v58 = vpop.permute.xlu0 %178  ;;  %v153_v61 = vadd.f32 %v149_v54, %v136_v47  ;;  %v154_v62 = vadd.f32 %v150_v55, %v137_v48  ;;  %v151_v16 = vadd.f32 %v147_v7, %v134_v2  ;;  %v152_v17 = vadd.f32 %v148_v8, %v135_v3 }
 0x121   :  { %v166_v63 = vmul.f32 %v1228_v52, %v162_v31  ;;  %v167_v1 = vmul.f32 %v1233_v53, %v162_v31  ;;  %v164_v19 = vmul.f32 %v1252_v5, %v162_v31  ;;  %v165_v25 = vmul.f32 %v1257_v6, %v162_v31  ;;  %v1300_v54 = vpop.f32.mrf.mxu0 }
 0x122   :  { %v183_v36 = vmul.f32 %v1264_v9, %v179_v58  ;;  %v184_v31 = vmul.f32 %v1269_v10, %v179_v58  ;;  %v181_v38 = vmul.f32 %v1274_v13, %v179_v58  ;;  %v182_v50 = vmul.f32 %v1291_v35, %v179_v58 }
 0x123   :  { %v170_v11 = vadd.f32 %v166_v63, %v153_v61  ;;  %v171_v0 = vadd.f32 %v167_v1, %v154_v62  ;;  %v168_v47 = vadd.f32 %v164_v19, %v151_v16  ;;  %v169_v48 = vadd.f32 %v165_v25, %v152_v17  ;;  %v1309_v62 = vld [vmem:[%s1521_s3 + $0xc0] sm:$0xff]  ;;  %v917_v7 = vpop.f32.mrf.mxu0 }
 0x125   :  { %v469_v49 = vpop.permute.xlu1 %468  ;;  %v196_v28 = vpop.permute.xlu0 %195  ;;  %v187_v41 = vadd.f32 %v183_v36, %v170_v11  ;;  %v188_v44 = vadd.f32 %v184_v31, %v171_v0  ;;  %v185_v8 = vadd.f32 %v181_v38, %v168_v47 }
 0x126   :  { %v200_v42 = vmul.f32 %v1281_v26, %v196_v28  ;;  %v201_v43 = vmul.f32 %v1286_v27, %v196_v28  ;;  %v471_v55 = vmul.f32 %v469_v49, %v1190_v33  ;;  %v472_v56 = vmul.f32 %v469_v49, %v1195_v34  ;;  %v1318_v33 = vld [vmem:[%s1521_s3 + $0xf0] sm:$0xff]  ;;  %v1342_v47 = vpop.f32.mrf.mxu0 }
 0x127   :  { %v473_v57 = vmul.f32 %v469_v49, %v1156_v21  ;;  %v474_v61 = vmul.f32 %v469_v49, %v1161_v22  ;;  %v1325_v22 = vld [vmem:[%s1521_s3 + $0xf8] sm:$0xff]  ;;  %v198_v11 = vmul.f32 %v1309_v62, %v196_v28 }
 0x128   :  { %v204_v34 = vadd.f32 %v200_v42, %v187_v41 }
 0x12a   :  { %v481_v4 = vpop.permute.xlu1 %480  ;;  %v505_v0 = vpop.permute.xlu0 %504 }
 0x12b   :  { %v483_v51 = vmul.f32 %v1180_v30, %v481_v4  ;;  %v484_v63 = vmul.f32 %v1185_v32, %v481_v4  ;;  %v485_v58 = vmul.f32 %v1146_v18, %v481_v4  ;;  %v486_v30 = vmul.f32 %v1151_v20, %v481_v4 }
 0x12c   :  { %v205_v32 = vadd.f32 %v201_v43, %v188_v44  ;;  %v186_v43 = vadd.f32 %v182_v50, %v169_v48  ;;  %v932_v50 = vpop.f32.mrf.mxu0 }
 0x12d   :  { %v487_v49 = vadd.f32 %v483_v51, %v471_v55  ;;  %v488_v19 = vadd.f32 %v484_v63, %v472_v56  ;;  %v489_v25 = vadd.f32 %v485_v58, %v473_v57  ;;  %v490_v36 = vadd.f32 %v486_v30, %v474_v61 }
 0x12e   :  { %v508_v51 = vmul.f32 %v1245_v60, %v505_v0  ;;  %v509_v55 = vmul.f32 %v1216_v45, %v505_v0  ;;  %v870_v45 = vld [vmem:[%s1521_s3 + $0xe0] sm:$0xff] }
 0x12f   :  { %v493_v37 = vpop.permute.xlu1 %492 }
 0x130   :  { %v495_v1 = vmul.f32 %v1202_v39, %v493_v37  ;;  %v1334_v39 = vld [vmem:[%s1521_s3 + $0xc8] sm:$0xff]  ;;  %v496_v2 = vmul.f32 %v1207_v40, %v493_v37  ;;  %v497_v3 = vmul.f32 %v1166_v23, %v493_v37  ;;  %v498_v4 = vmul.f32 %v1171_v24, %v493_v37 }
 0x131   :  { %v199_v41 = vmul.f32 %v1334_v39, %v196_v28  ;;  %v507_v23 = vmul.f32 %v1240_v59, %v505_v0  ;;  %v510_v28 = vmul.f32 %v1221_v46, %v505_v0 }
 0x132   :  { %v499_v31 = vadd.f32 %v495_v1, %v487_v49  ;;  %v500_v24 = vadd.f32 %v496_v2, %v488_v19  ;;  %v501_v37 = vadd.f32 %v497_v3, %v489_v25  ;;  %v502_v38 = vadd.f32 %v498_v4, %v490_v36  ;;  %v871_v2 = vld [vmem:[%s1521_s3 + $0xe8] sm:$0xff] }
 0x133   :  { %v202_v49 = vadd.f32 %v198_v11, %v185_v8 }
 0x134   :  { %v1320_v21 = vpop.permute.xlu1 %212  ;;  %v511_v48 = vadd.f32 %v507_v23, %v499_v31  ;;  %v512_v30 = vadd.f32 %v508_v51, %v500_v24  ;;  %v513_v1 = vadd.f32 %v509_v55, %v501_v37 }
 0x135   :  { %v217_v18 = vmul.f32 %v1318_v33, %v1320_v21  ;;  %v218_v20 = vmul.f32 %v1325_v22, %v1320_v21 }
 0x137   :  { %v221_v16 = vadd.f32 %v217_v18, %v204_v34  ;;  %v222_v17 = vadd.f32 %v218_v20, %v205_v32  ;;  %v514_v34 = vadd.f32 %v510_v28, %v502_v38  ;;  %v215_v18 = vmul.f32 %v870_v45, %v1320_v21  ;;  %v599_v20 = vpop.f32.mrf.mxu0 }
 0x139   :  { %v298_v42 = vadd.f32 %v917_v7, %v222_v17  ;;  %v517_v40 = vpop.permute.xlu1 %516  ;;  %v297_v44 = vadd.f32 %v916_v29, %v221_v16  ;;  %v553_v16 = vpop.permute.xlu0 %552  ;;  %v203_v17 = vadd.f32 %v199_v41, %v186_v43 }
 0x13a   :  { %v519_v29 = vmul.f32 %v1252_v5, %v517_v40  ;;  %v520_v59 = vmul.f32 %v1257_v6, %v517_v40  ;;  %v521_v63 = vmul.f32 %v1228_v52, %v517_v40  ;;  %v522_v58 = vmul.f32 %v1233_v53, %v517_v40  ;;  %v933_v40 = vpop.f32.mrf.mxu0 }
 0x13b   :  { %v326_v56 = vadd.f32 %v1139_v14, %v298_v42  ;;  %v325_v57 = vadd.f32 %v1141_v15, %v297_v44  ;;  %v557_v41 = vmul.f32 %v1318_v33, %v553_v16  ;;  %v558_v43 = vmul.f32 %v1325_v22, %v553_v16 }
 0x13c   :  { %v523_v3 = vadd.f32 %v519_v29, %v511_v48  ;;  %v524_v4 = vadd.f32 %v520_v59, %v512_v30  ;;  %v525_v7 = vadd.f32 %v521_v63, %v513_v1  ;;  %v526_v0 = vadd.f32 %v522_v58, %v514_v34 }
 0x13d   :  { %v330_v61 = vmax.f32 %v326_v56, 0.0  ;;  %v329_v60 = vmax.f32 %v325_v57, 0.0  ;;  %v556_v44 = vmul.f32 %v871_v2, %v553_v16 }
 0x13e   :  { %v529_v46 = vpop.permute.xlu1 %528 }
 0x13f   :  { %v531_v5 = vmul.f32 %v1274_v13, %v529_v46  ;;  %v532_v6 = vmul.f32 %v1291_v35, %v529_v46  ;;  %v533_v32 = vmul.f32 %v1264_v9, %v529_v46  ;;  %v534_v52 = vmul.f32 %v1269_v10, %v529_v46 }
 0x140   :  { %v336_v53 = vpack.c.bf16 %v330_v61, %v329_v60  ;;  %v216_v13 = vmul.f32 %v871_v2, %v1320_v21  ;;  %v219_v35 = vadd.f32 %v215_v18, %v202_v49  ;;  %v555_v21 = vmul.f32 %v870_v45, %v553_v16 }
 0x141   :  { %v537_v9 = vadd.f32 %v533_v32, %v525_v7  ;;  %v535_v19 = vadd.f32 %v531_v5, %v523_v3  ;;  %v538_v25 = vadd.f32 %v534_v52, %v526_v0  ;;  %v536_v8 = vadd.f32 %v532_v6, %v524_v4 }
 0x142   :  { %918 = vmatprep.subr.bf16.mxu1 %v336_v53  ;;  %v220_v51 = vadd.f32 %v216_v13, %v203_v17 }
 0x143   :  { %919 = vmatpush3.bf16.msra.mxu1 %v336_v53  ;;  %v541_v10 = vpop.permute.xlu1 %540 }
 0x144   :  { %v543_v11 = vmul.f32 %v1309_v62, %v541_v10  ;;  %v544_v36 = vmul.f32 %v1334_v39, %v541_v10  ;;  %v545_v31 = vmul.f32 %v1281_v26, %v541_v10  ;;  %v546_v42 = vmul.f32 %v1286_v27, %v541_v10  ;;  %v602_v27 = vpop.f32.mrf.mxu0 }
 0x145   :  { %v295_v62 = vadd.f32 %v1300_v54, %v219_v35  ;;  %v296_v22 = vadd.f32 %v1342_v47, %v220_v51  ;;  %v972_v47 = vld [vmem:[%s1520_s6 + $0x8] sm:$0xff]  }
 0x146   :  { %v549_v23 = vadd.f32 %v545_v31, %v537_v9  ;;  %v547_v24 = vadd.f32 %v543_v11, %v535_v19  ;;  %v550_v37 = vadd.f32 %v546_v42, %v538_v25  ;;  %v548_v38 = vadd.f32 %v544_v36, %v536_v8 }
 0x148   :  { %v561_v55 = vadd.f32 %v557_v41, %v549_v23  ;;  %v559_v39 = vadd.f32 %v555_v21, %v547_v24  ;;  %v562_v56 = vadd.f32 %v558_v43, %v550_v37  ;;  %v306_v26 = vpop.permute.xlu1 %305  ;;  %v560_v57 = vadd.f32 %v556_v44, %v548_v38  ;;  %v344_v32 = vpop.permute.xlu0 %343 }
 0x149   :  { %v323_v33 = vadd.f32 %v306_v26, %v295_v62 }
 0x14a   :  { %v614_v28 = vadd.f32 %v599_v20, %v559_v39  ;;  %v617_v48 = vadd.f32 %v933_v40, %v562_v56  ;;  %v616_v29 = vadd.f32 %v932_v50, %v561_v55  ;;  %v615_v59 = vadd.f32 %v602_v27, %v560_v57 }
 0x14b   :  { %v327_v54 = vmax.f32 %v323_v33, 0.0 }
 0x14c   :  { %v621_v61 = vadd.f32 %v617_v48, %v1139_v14  ;;  %v311_v63 = vpop.permute.xlu1 %310  ;;  %v620_v58 = vadd.f32 %v616_v29, %v1141_v15  ;;  %v618_v45 = vadd.f32 %v614_v28, %v306_v26  ;;  %v359_v2 = vpop.permute.xlu0 %358 }
 0x14d   :  { %v324_v60 = vadd.f32 %v311_v63, %v296_v22  ;;  %v619_v34 = vadd.f32 %v615_v59, %v311_v63 }
 0x14e   :  { %v625_v30 = vmax.f32 %v621_v61, 0.0  ;;  %v624_v46 = vmax.f32 %v620_v58, 0.0  ;;  %v622_v5 = vmax.f32 %v618_v45, 0.0 }
 0x14f   :  { %v328_v1 = vmax.f32 %v324_v60, 0.0  ;;  %v623_v6 = vmax.f32 %v619_v34, 0.0 }
 0x150   :  { %v627_v50 = vpack.c.bf16 %v625_v30, %v624_v46  ;;  %v349_v15 = vpop.permute.xlu1 %348 }
 0x151   :  { %v335_v18 = vpack.c.bf16 %v328_v1, %v327_v54  ;;  %v626_v14 = vpack.c.bf16 %v623_v6, %v622_v5 }
 0x153   :  { %920 = vmatprep.subr.bf16.mxu1 %v335_v18 }
 0x154   :  { %921 = vmatpush3.bf16.msra.mxu1 %v335_v18  ;;  %v354_v52 = vpop.permute.xlu1 %353 }
 0x155   :  { %934 = vmatprep.subr.bf16.mxu1 %v627_v50 }
 0x157   :  { %923 = vmatmul.mubr.msk.bf16.vlgmr.msra.gmra.mxu1 %vm239_vm0, %v972_v47 }
 0x158   :  { %935 = vmatpush3.bf16.msra.mxu1 %v627_v50  ;;  %938 = vmatprep.mubr.msk.bf16.mxu1 %vm239_vm0, %v1129_v12 }
 0x159   :  { %936 = vmatprep.subr.bf16.mxu1 %v626_v14 }
 0x15c   :  { %937 = vmatpush3.bf16.msra.mxu1 %v626_v14 }
 0x15f   :  { %939 = vmatmul.mubr.msk.bf16.vlgmr.msra.gmra.mxu1 %vm239_vm0, %v972_v47 }
 0x217   :  { %v924_v53 = vpop.f32.mrf.mxu1 }
 0x218   :  { %v1382_v20 = vadd.f32 %v924_v53, %v354_v52 }
 0x219   :  { %v411_v49 = vpop.f32.mrf.mxu1 }
 0x21a   :  { %v1384_v3 = vadd.f32 %v411_v49, %v344_v32  ;;  %v432_v4 = vsel %vm70_vm1, %v1382_v20, 0.0 }
 0x21b   :  { %433 = vadd.xlane.f32.xlu0 %v432_v4  ;;  %v925_v7 = vpop.f32.mrf.mxu1 }
 0x21c   :  { %v1388_v12 = vadd.f32 %v925_v7, %v359_v2  ;;  %v426_v0 = vsel %vm70_vm1, %v1384_v3, 0.0 }
 0x21d   :  { %v414_v16 = vpop.f32.mrf.mxu1  ;;  %427 = vadd.xlane.f32.xlu1 %v426_v0 }
 0x21e   :  { %v1392_v17 = vadd.f32 %v414_v16, %v349_v15  ;;  %v435_v9 = vsel %vm70_vm1, %v1388_v12, 0.0 }
 0x21f   :  { %v940_v13 = vpop.f32.mrf.mxu1 }
 0x220   :  { %v429_v35 = vsel %vm70_vm1, %v1392_v17, 0.0  ;;  %v1400_v8 = vadd.f32 %v940_v13, %v354_v52 }
 0x221   :  { %430 = vadd.xlane.f32.xlu0 %v429_v35  ;;  %v662_v10 = vpop.f32.mrf.mxu1  ;;  %436 = vadd.xlane.f32.xlu1 %v435_v9 }
 0x222   :  { %v1398_v19 = vadd.f32 %v662_v10, %v344_v32  ;;  %v683_v40 = vsel %vm70_vm1, %v1400_v8, 0.0 }
 0x223   :  { %v941_v25 = vpop.f32.mrf.mxu1 }
 0x224   :  { %v677_v11 = vsel %vm70_vm1, %v1398_v19, 0.0  ;;  %v1406_v42 = vadd.f32 %v941_v25, %v359_v2 }
 0x225   :  { %v665_v36 = vpop.f32.mrf.mxu1  ;;  %678 = vadd.xlane.f32.xlu0 %v677_v11 }
 0x226   :  { %v1404_v31 = vadd.f32 %v665_v36, %v349_v15  ;;  %v686_v21 = vsel %vm70_vm1, %v1406_v42, 0.0 }
 0x228   :  { %v680_v41 = vsel %vm70_vm1, %v1404_v31, 0.0 }
 0x229   :  { %684 = vadd.xlane.f32.xlu0 %v683_v40  ;;  %681 = vadd.xlane.f32.xlu1 %v680_v41 }
 0x22d   :  { %687 = vadd.xlane.f32.xlu1 %v686_v21 }
 0x2a4   :  { %v434_v43 = vpop.xlane.xlu0 %433 }
 0x2a6   :  { %v428_v44 = vpop.xlane.xlu1 %427 }
 0x2aa   :  { %v431_v23 = vpop.xlane.xlu0 %430  ;;  %v437_v24 = vpop.xlane.xlu1 %436 }
 0x2ae   :  { %v679_v37 = vpop.xlane.xlu0 %678 }
 0x2af   :  { %v689_v38 = vadd.f32 %v679_v37, %v428_v44  ;;  %v749_v37 = vld [vmem:[%s1522_s8] sm:$0xff] }
 0x2b1   :  { %v1414_v51 = vmul.f32 0.0625, %v689_v38 }
 0x2b2   :  { %v682_v62 = vpop.xlane.xlu1 %681  ;;  %v685_v55 = vpop.xlane.xlu0 %684 }
 0x2b3   :  { %v690_v39 = vadd.f32 %v682_v62, %v431_v23  ;;  %v691_v56 = vadd.f32 %v685_v55, %v434_v43  ;;  %v697_v27 = vsub.f32 %v1384_v3, %v1414_v51  ;;  %v721_v61 = vsub.f32 %v1398_v19, %v1414_v51  ;;  %v750_v55 = vld [vmem:[%s1522_s8 + $0x8] sm:$0xff] }
 0x2b5   :  { %v1416_v26 = vmul.f32 0.0625, %v691_v56  ;;  %v1420_v28 = vmul.f32 0.0625, %v690_v39  ;;  %v701_v59 = vmul.f32 %v697_v27, %v697_v27  ;;  %v725_v30 = vmul.f32 %v721_v61, %v721_v61  ;;  %v751_v39 = vld [vmem:[%s1522_s8 + $0x10] sm:$0xff] }
 0x2b6   :  { %v688_v57 = vpop.xlane.xlu1 %687 }
 0x2b7   :  { %v692_v48 = vadd.f32 %v688_v57, %v437_v24  ;;  %v699_v33 = vsub.f32 %v1382_v20, %v1416_v26  ;;  %v698_v60 = vsub.f32 %v1392_v17, %v1420_v28  ;;  %v705_v45 = vsel %vm70_vm1, %v701_v59, 0.0 }
 0x2b8   :  { %v722_v46 = vsub.f32 %v1404_v31, %v1420_v28  ;;  %v723_v18 = vsub.f32 %v1400_v8, %v1416_v26  ;;  %v729_v5 = vsel %vm70_vm1, %v725_v30, 0.0 }
 0x2b9   :  { %v1424_v29 = vmul.f32 0.0625, %v692_v48  ;;  %v703_v22 = vmul.f32 %v699_v33, %v699_v33  ;;  %v702_v34 = vmul.f32 %v698_v60, %v698_v60  ;;  %v752_v33 = vld [vmem:[%s1522_s8 + $0x18] sm:$0xff]  ;;  %v765_v60 = vld [vmem:[%s1523_s9] sm:$0xff] }
 0x2ba   :  { %v726_v50 = vmul.f32 %v722_v46, %v722_v46  ;;  %v727_v47 = vmul.f32 %v723_v18, %v723_v18 }
 0x2bb   :  { %v711_v63 = vsel %vm70_vm1, %v703_v22, 0.0  ;;  %v700_v58 = vsub.f32 %v1388_v12, %v1424_v29  ;;  %v708_v6 = vsel %vm70_vm1, %v702_v34, 0.0  ;;  %v724_v14 = vsub.f32 %v1406_v42, %v1424_v29 }
 0x2bc   :  { %712 = vadd.xlane.f32.xlu0 %v711_v63  ;;  %v732_v15 = vsel %vm70_vm1, %v726_v50, 0.0  ;;  %v735_v32 = vsel %vm70_vm1, %v727_v47, 0.0  ;;  %v766_v63 = vld [vmem:[%s1523_s9 + $0x8] sm:$0xff] }
 0x2bd   :  { %v704_v54 = vmul.f32 %v700_v58, %v700_v58  ;;  %v728_v52 = vmul.f32 %v724_v14, %v724_v14 }
 0x2bf   :  { %v714_v1 = vsel %vm70_vm1, %v704_v54, 0.0  ;;  %v738_v53 = vsel %vm70_vm1, %v728_v52, 0.0 }
 0x2c0   :  { %715 = vadd.xlane.f32.xlu1 %v714_v1  ;;  %706 = vadd.xlane.f32.xlu0 %v705_v45 }
 0x2c4   :  { %709 = vadd.xlane.f32.xlu1 %v708_v6  ;;  %730 = vadd.xlane.f32.xlu0 %v729_v5 }
 0x2c8   :  { %733 = vadd.xlane.f32.xlu1 %v732_v15  ;;  %736 = vadd.xlane.f32.xlu0 %v735_v32 }
 0x2cc   :  { %739 = vadd.xlane.f32.xlu1 %v738_v53 }
 0x345   :  { %v713_v49 = vpop.xlane.xlu0 %712 }
 0x349   :  { %v716_v2 = vpop.xlane.xlu1 %715  ;;  %v707_v4 = vpop.xlane.xlu0 %706 }
 0x34d   :  { %v710_v7 = vpop.xlane.xlu1 %709  ;;  %v731_v0 = vpop.xlane.xlu0 %730 }
 0x34e   :  { %v741_v16 = vadd.f32 %v731_v0, %v707_v4 }
 0x350   :  { %v745_v13 = vmul.f32 0.0625, %v741_v16 }
 0x351   :  { %v734_v35 = vpop.xlane.xlu1 %733  ;;  %v737_v9 = vpop.xlane.xlu0 %736 }
 0x352   :  { %v753_v10 = vadd.f32 1e-05, %v745_v13  ;;  %v742_v25 = vadd.f32 %v734_v35, %v710_v7  ;;  %v743_v11 = vadd.f32 %v737_v9, %v713_v49 }
 0x354   :  { %973 = vrsqrt.f32 %v753_v10  ;;  %v746_v36 = vmul.f32 0.0625, %v742_v25  ;;  %v747_v40 = vmul.f32 0.0625, %v743_v11 }
 0x355   :  { %v740_v41 = vpop.xlane.xlu1 %739 }
 0x356   :  { %v754_v21 = vadd.f32 1e-05, %v746_v36  ;;  %v755_v43 = vadd.f32 1e-05, %v747_v40  ;;  %v744_v44 = vadd.f32 %v740_v41, %v716_v2 }
 0x358   :  { %975 = vrsqrt.f32 %v754_v21  ;;  %v748_v23 = vmul.f32 0.0625, %v744_v44 }
 0x359   :  { %977 = vrsqrt.f32 %v755_v43 }
 0x35a   :  { %v756_v24 = vadd.f32 1e-05, %v748_v23 }
 0x35c   :  { %979 = vrsqrt.f32 %v756_v24 }
 0x361   :  { %v974_v38 = vpop.eup %973 }
 0x362   :  { %v761_v62 = vmul.f32 %v974_v38, %v749_v37 }
 0x364   :  { %779 = vperm.xlu0 %968, %v761_v62   ;;  %v769_v58 = vmul.f32 %v761_v62, %v1414_v51  ;;  %v767_v51 = vld [vmem:[%s1523_s9 + $0x10] sm:$0xff] }
 0x365   :  { %v976_v56 = vpop.eup %975 }
 0x366   :  { %v978_v57 = vpop.eup %977  ;;  %v762_v27 = vmul.f32 %v976_v56, %v750_v55  ;;  %v773_v30 = vsub.f32 %v765_v60, %v769_v58 }
 0x367   :  { %v763_v48 = vmul.f32 %v978_v57, %v751_v39 }
 0x368   :  { %v770_v61 = vmul.f32 %v762_v27, %v1420_v28  ;;  %v768_v28 = vld [vmem:[%s1523_s9 + $0x18] sm:$0xff] }
 0x369   :  { %v980_v22 = vpop.eup %979  ;;  %789 = vperm.xlu1 %967, %v763_v48   ;;  %v771_v1 = vmul.f32 %v763_v48, %v1416_v26 }
 0x36a   :  { %v764_v59 = vmul.f32 %v980_v22, %v752_v33  ;;  %v774_v54 = vsub.f32 %v766_v63, %v770_v61 }
 0x36b   :  { %v775_v46 = vsub.f32 %v767_v51, %v771_v1 }
 0x36c   :  { %794 = vperm.xlu0 %968, %v764_v59   ;;  %v772_v45 = vmul.f32 %v764_v59, %v1424_v29 }
 0x36d   :  { %784 = vperm.xlu1 %967, %v762_v27  }
 0x36e   :  { %v776_v34 = vsub.f32 %v768_v28, %v772_v45 }
 0x370   :  { %808 = vperm.xlu0 %968, %v774_v54  }
 0x371   :  { %803 = vperm.xlu1 %967, %v773_v30  }
 0x374   :  { %818 = vperm.xlu0 %968, %v776_v34  }
 0x375   :  { %813 = vperm.xlu1 %967, %v775_v46  }
 0x3df   :  { %v780_v18 = vpop.permute.xlu0 %779 }
 0x3e0   :  { %v797_v26 = vmul.f32 %v780_v18, %v1384_v3  ;;  %v829_v14 = vmul.f32 %v780_v18, %v1398_v19 }
 0x3e4   :  { %v790_v5 = vpop.permute.xlu1 %789 }
 0x3e5   :  { %v799_v3 = vmul.f32 %v790_v5, %v1382_v20 }
 0x3e7   :  { %v795_v29 = vpop.permute.xlu0 %794 }
 0x3e8   :  { %v785_v6 = vpop.permute.xlu1 %784  ;;  %v800_v4 = vmul.f32 %v795_v29, %v1388_v12  ;;  %v832_v7 = vmul.f32 %v795_v29, %v1406_v42 }
 0x3e9   :  { %v798_v50 = vmul.f32 %v785_v6, %v1392_v17  ;;  %v830_v47 = vmul.f32 %v785_v6, %v1404_v31  ;;  %v831_v17 = vmul.f32 %v790_v5, %v1400_v8 }
 0x3eb   :  { %v809_v15 = vpop.permute.xlu0 %808 }
 0x3ec   :  { %v804_v32 = vpop.permute.xlu1 %803  ;;  %v822_v52 = vadd.f32 %v809_v15, %v798_v50  ;;  %v834_v53 = vadd.f32 %v830_v47, %v809_v15 }
 0x3ed   :  { %v821_v49 = vadd.f32 %v804_v32, %v797_v26  ;;  %v833_v2 = vadd.f32 %v829_v14, %v804_v32 }
 0x3ee   :  { %826 = vst.msk [vmem:[%s1524_s10 + $0x8] sm:$0xff] %vm70_vm1, %v822_v52  ;;  %891 = vst.msk [vmem:[%s1524_s10 + $0x28] sm:$0xff] %vm70_vm1, %v834_v53 }
 0x3ef   :  { %825 = vst.msk [vmem:[%s1524_s10] sm:$0xff] %vm70_vm1, %v821_v49  ;;  %890 = vst.msk [vmem:[%s1524_s10 + $0x20] sm:$0xff] %vm70_vm1, %v833_v2  ;;  %v819_v12 = vpop.permute.xlu0 %818 }
 0x3f0   :  { %v814_v19 = vpop.permute.xlu1 %813  ;;  %v824_v31 = vadd.f32 %v819_v12, %v800_v4  ;;  %v836_v42 = vadd.f32 %v832_v7, %v819_v12 }
 0x3f1   :  { %v823_v0 = vadd.f32 %v814_v19, %v799_v3  ;;  %v835_v16 = vadd.f32 %v831_v17, %v814_v19 }
 0x3f2   :  { %828 = vst.msk [vmem:[%s1524_s10 + $0x18] sm:$0xff] %vm70_vm1, %v824_v31  ;;  %893 = vst.msk [vmem:[%s1524_s10 + $0x38] sm:$0xff] %vm70_vm1, %v836_v42 }
 0x3f3   :  { %827 = vst.msk [vmem:[%s1524_s10 + $0x10] sm:$0xff] %vm70_vm1, %v823_v0  ;;  %892 = vst.msk [vmem:[%s1524_s10 + $0x30] sm:$0xff] %vm70_vm1, %v835_v16 }

</bundles_post_ra>
